<compile_context>
chip_gen: v7x
topology: tpu7x:2x2x1
jax: 0.10.0
libtpu: 0.0.40
codegen_flags: <defaults>
</compile_context>

<pallas_src>
import functools

import jax
import jax.numpy as jnp
from jax.experimental import pallas as pl
from jax.experimental.pallas import tpu as pltpu


def _final_conv_kernel(x_ref, mask_ref, w1_ref, w2_ref, o_ref, *, W, lanes):
    """One lane-block (one or more whole images), channels on sublanes / spatial on lanes.

    x_ref:    (Cin_p, lanes)        flattened images (+ constant-ones channel, + zero pad)
    mask_ref: (9*Cin_p, lanes)      per-tap border validity, pre-broadcast over channels
    w1_ref:   (Cmid_p, 9*Cin_p)     3x3 conv weights, im2col layout, BN scale/shift folded in
    w2_ref:   (Cout, Cmid_p)        1x1 conv weights (transposed), bias folded in
    o_ref:    (Cout, lanes)
    """
    x = x_ref[...]

    # Each 3x3 tap is a lane-axis rotation (XLU) of the flattened image block; the
    # precomputed masks replace zero padding (and zero any wrap-around pickup).
    taps = []
    for dy in range(3):
        for dx in range(3):
            off = (dy - 1) * W + (dx - 1)
            if off != 0:
                taps.append(pltpu.roll(x, shift=(-off) % lanes, axis=1))
            else:
                taps.append(x)
    # 8-sublane-aligned taps -> concat is pure tile placement; one full-width mask multiply.
    patches = jnp.concatenate(taps, axis=0) * mask_ref[...]          # (9*Cin_p, lanes)

    # Fused 3x3 conv + BN: scale folded into w1, shift rides on the constant-ones channel.
    y = jnp.dot(w1_ref[...], patches, preferred_element_type=jnp.float32)
    # TODO(synk): Convolutional's activation slope assumed LeakyReLU(0.1) (YOLO convention).
    y = jnp.where(y > 0, y, 0.1 * y)

    # 1x1 conv: bias rides on the constant-ones mid channel of w2.
    o_ref[...] = jnp.dot(w2_ref[...], y,
                         preferred_element_type=jnp.float32).astype(o_ref.dtype)


def _round_up(n, m):
    return (n + m - 1) // m * m


@functools.partial(jax.jit, static_argnums=(6,))
def _final_conv_impl(x_nchw, w1_hwio, bn_scale, bn_shift, w2, b2, grid_n):
    B, Cin, H, W = x_nchw.shape
    Cmid = w1_hwio.shape[3]
    Cout = w2.shape[1]
    dtype = x_nchw.dtype
    HW = H * W
    HWp = _round_up(HW, 128)         # keep every store lane-dense (multiple of 128 lanes)
    Cinp = _round_up(Cin + 1, 8)     # +1: constant-ones channel (carries BN shift)
    Cmidp = _round_up(Cmid + 1, 8)   # +1: constant-ones mid channel (carries 1x1 bias)
    imgs_per_block = B // grid_n
    lanes = imgs_per_block * HWp

    # ---- input: (B,Cin,H,W) -> channels-major (Cin_p, B*HW_p) with ones channel appended.
    x_flat = jnp.pad(x_nchw.reshape(B, Cin, HW), ((0, 0), (0, 0), (0, HWp - HW)))
    extra = jnp.concatenate(
        [jnp.ones((B, 1, HWp), dtype), jnp.zeros((B, Cinp - Cin - 1, HWp), dtype)], axis=1)
    x_p = jnp.concatenate([x_flat, extra], axis=1)                   # (B, Cin_p, HW_p)
    x_p = jnp.transpose(x_p, (1, 0, 2)).reshape(Cinp, B * HWp)

    # ---- 3x3 weights -> im2col matrix (tap-major, Cin_p channels), BN scale folded in.
    #      The ones-channel column of the center tap carries the BN shift, plus a 1.0 on the
    #      synthetic mid row that later carries the 1x1 bias.
    w1_scaled = w1_hwio * bn_scale[None, None, None, :]              # (3,3,Cin,Cmid)
    w1_k = jnp.transpose(w1_scaled, (3, 0, 1, 2)).reshape(Cmid, 9, Cin)
    w1_k = jnp.pad(w1_k, ((0, Cmidp - Cmid), (0, 0), (0, Cinp - Cin)))
    center = 4  # tap (dy=1, dx=1)
    ones_col = jnp.zeros((Cmidp,), dtype).at[:Cmid].set(bn_shift).at[Cmid].set(1.0)
    w1_fold = w1_k.at[:, center, Cin].set(ones_col).reshape(Cmidp, 9 * Cinp)

    # ---- 1x1 weights (Cout, Cmid_p): extra column Cmid is the bias.
    w2_aug = (jnp.zeros((Cout, Cmidp), dtype)
              .at[:, :Cmid].set(jnp.transpose(w2))
              .at[:, Cmid].set(b2))

    # ---- per-tap border masks, pre-broadcast over channels and tiled over the images of one
    #      grid block. Zero = conv zero-padding, pad lane, or would-be cross-image/array wrap.
    yy = jnp.arange(H)[:, None]
    xx = jnp.arange(W)[None, :]
    rows = []
    for dy in range(3):
        for dx in range(3):
            oy, ox = dy - 1, dx - 1
            valid = ((yy + oy >= 0) & (yy + oy < H) & (xx + ox >= 0) & (xx + ox < W))
            rows.append(jnp.pad(valid.reshape(HW), (0, HWp - HW)))
    mask = jnp.stack(rows, axis=0).astype(dtype)                     # (9, HW_p)
    mask = jnp.repeat(mask, Cinp, axis=0)                            # (9*Cin_p, HW_p)
    mask = jnp.tile(mask, (1, imgs_per_block))                       # (9*Cin_p, lanes)

    kernel = functools.partial(_final_conv_kernel, W=W, lanes=lanes)

    out = pl.pallas_call(
        kernel,
        out_shape=jax.ShapeDtypeStruct((Cout, B * HWp), dtype),
        grid=(grid_n,),
        in_specs=[
            pl.BlockSpec((Cinp, lanes), lambda i: (0, i)),
            pl.BlockSpec((9 * Cinp, lanes), lambda i: (0, 0)),
            pl.BlockSpec((Cmidp, 9 * Cinp), lambda i: (0, 0)),
            pl.BlockSpec((Cout, Cmidp), lambda i: (0, 0)),
        ],
        out_specs=pl.BlockSpec((Cout, lanes), lambda i: (0, i)),
        compiler_params=pltpu.CompilerParams(dimension_semantics=("parallel",)),
    )(x_p, mask, w1_fold, w2_aug)

    # Drop spatial pad lanes and return to NCHW.
    out = out.reshape(Cout, B, HWp)[:, :, :HW]
    return jnp.transpose(out, (1, 0, 2)).reshape(B, Cout, H, W)


def final_convolutional(x_nchw, w1_hwio, bn_scale, bn_shift, w2, b2):
    """Pallas-backed forward pass; NCHW in/out like the PyTorch module."""
    B = x_nchw.shape[0]
    # Single grid step on 1-TC chips (v5e/v6e) to minimize fixed per-step overhead;
    # keep 2 parallel whole-image blocks on 2-TC v7x so both TensorCores are fed.
    try:
        kind = jax.devices()[0].device_kind.lower()
    except Exception:  # pragma: no cover - defensive
        kind = ""
    grid_n = 2 if ("v7" in kind and B % 2 == 0) else 1
    return _final_conv_impl(x_nchw, w1_hwio, bn_scale, bn_shift, w2, b2, grid_n)


def _reference(x_nchw, w1_hwio, bn_scale, bn_shift, w2, b2):
    """Pure-JAX reference (lax.conv) for correctness checking."""
    w1_oihw = jnp.transpose(w1_hwio, (3, 2, 0, 1))  # HWIO -> OIHW
    y = jax.lax.conv_general_dilated(
        x_nchw, w1_oihw, window_strides=(1, 1), padding=((1, 1), (1, 1)),
        dimension_numbers=("NCHW", "OIHW", "NCHW"),
    )
    y = y * bn_scale[None, :, None, None] + bn_shift[None, :, None, None]
    y = jnp.where(y > 0, y, 0.1 * y)
    w2_oihw = jnp.transpose(w2, (1, 0))[:, :, None, None]  # (Cout, Cmid, 1, 1)
    z = jax.lax.conv_general_dilated(
        y, w2_oihw, window_strides=(1, 1), padding=((0, 0), (0, 0)),
        dimension_numbers=("NCHW", "OIHW", "NCHW"),
    )
    return z + b2[None, :, None, None]


if __name__ == "__main__":
    # Small shapes consistent with the module: in_channels=4, mid_channels=8,
    # out_channels=12, batch=2, spatial=16.
    B, Cin, Cmid, Cout, H, W = 2, 4, 8, 12, 16, 16
    eps = 1e-5

    key = jax.random.PRNGKey(0)
    k = jax.random.split(key, 7)

    x = jax.random.normal(k[0], (B, Cin, H, W), jnp.float32)

    # Conv2d(in, mid, 3, padding=1, bias=False) weights in HWIO layout.
    w1_hwio = 0.1 * jax.random.normal(k[1], (3, 3, Cin, Cmid), jnp.float32)

    # BatchNorm2d(mid) inference parameters, folded into scale/shift.
    gamma = 1.0 + 0.1 * jax.random.normal(k[2], (Cmid,), jnp.float32)
    beta = 0.05 * jax.random.normal(k[3], (Cmid,), jnp.float32)
    running_mean = 0.1 * jax.random.normal(k[4], (Cmid,), jnp.float32)
    running_var = jnp.abs(jax.random.normal(k[5], (Cmid,), jnp.float32)) + 0.5
    bn_scale = gamma / jnp.sqrt(running_var + eps)
    bn_shift = beta - running_mean * bn_scale

    # Conv2d(mid, out, 1, bias=True).
    w2 = 0.1 * jax.random.normal(k[6], (Cmid, Cout), jnp.float32)
    b2 = 0.01 * jnp.arange(Cout, dtype=jnp.float32)

    out = final_convolutional(x, w1_hwio, bn_scale, bn_shift, w2, b2)
    out = jax.block_until_ready(out)

    ref = _reference(x, w1_hwio, bn_scale, bn_shift, w2, b2)
    assert out.shape == (B, Cout, H, W), out.shape
    assert jnp.allclose(out, ref, rtol=1e-4, atol=1e-4), float(
        jnp.max(jnp.abs(out - ref))
    )

    print("KERNEL_OK")
</pallas_src>

<mosaic_0001>
module attributes {stable_mosaic.version = 11 : i64} {
  func.func @_final_conv_kernel(%arg0: i32, %arg1: memref<8x512xf32, #tpu.memory_space<vmem>>, %arg2: memref<72x512xf32, #tpu.memory_space<vmem>>, %arg3: memref<16x72xf32, #tpu.memory_space<vmem>>, %arg4: memref<12x16xf32, #tpu.memory_space<vmem>>, %arg5: memref<12x512xf32, #tpu.memory_space<vmem>>) attributes {dimension_semantics = [#tpu.dimension_semantics<parallel>], iteration_bounds = array<i64: 1>, scalar_prefetch = 0 : i64, scratch_operands = 0 : i64, tpu.core_type = #tpu.core_type<tc>, window_params = [{transform_indices = @transform_0, window_bounds = array<i64: 8, 512>}, {pipeline_mode = #tpu.pipeline_mode<synchronous>, transform_indices = @transform_1, window_bounds = array<i64: 72, 512>}, {pipeline_mode = #tpu.pipeline_mode<synchronous>, transform_indices = @transform_2, window_bounds = array<i64: 16, 72>}, {pipeline_mode = #tpu.pipeline_mode<synchronous>, transform_indices = @transform_3, window_bounds = array<i64: 12, 16>}, {transform_indices = @transform_4, window_bounds = array<i64: 12, 512>}]} {
    %c0 = arith.constant 0 : index
    %c0_0 = arith.constant 0 : index
    %0 = vector.load %arg1[%c0, %c0_0] : memref<8x512xf32, #tpu.memory_space<vmem>>, vector<8x512xf32>
    %c17_i32 = arith.constant 17 : i32
    %1 = tpu.dynamic_rotate %0 by %c17_i32 dim 1 : vector<8x512xf32>, i32 -> vector<8x512xf32>
    %c16_i32 = arith.constant 16 : i32
    %2 = tpu.dynamic_rotate %0 by %c16_i32 dim 1 : vector<8x512xf32>, i32 -> vector<8x512xf32>
    %c15_i32 = arith.constant 15 : i32
    %3 = tpu.dynamic_rotate %0 by %c15_i32 dim 1 : vector<8x512xf32>, i32 -> vector<8x512xf32>
    %c1_i32 = arith.constant 1 : i32
    %4 = tpu.dynamic_rotate %0 by %c1_i32 dim 1 : vector<8x512xf32>, i32 -> vector<8x512xf32>
    %c511_i32 = arith.constant 511 : i32
    %5 = tpu.dynamic_rotate %0 by %c511_i32 dim 1 : vector<8x512xf32>, i32 -> vector<8x512xf32>
    %c497_i32 = arith.constant 497 : i32
    %6 = tpu.dynamic_rotate %0 by %c497_i32 dim 1 : vector<8x512xf32>, i32 -> vector<8x512xf32>
    %c496_i32 = arith.constant 496 : i32
    %7 = tpu.dynamic_rotate %0 by %c496_i32 dim 1 : vector<8x512xf32>, i32 -> vector<8x512xf32>
    %c495_i32 = arith.constant 495 : i32
    %8 = tpu.dynamic_rotate %0 by %c495_i32 dim 1 : vector<8x512xf32>, i32 -> vector<8x512xf32>
    %9 = tpu.concatenate %1, %2, %3, %4, %0, %5, %6, %7, %8 in 0 : vector<8x512xf32>, vector<8x512xf32>, vector<8x512xf32>, vector<8x512xf32>, vector<8x512xf32>, vector<8x512xf32>, vector<8x512xf32>, vector<8x512xf32>, vector<8x512xf32> -> vector<72x512xf32>
    %c0_1 = arith.constant 0 : index
    %c0_2 = arith.constant 0 : index
    %10 = vector.load %arg2[%c0_1, %c0_2] : memref<72x512xf32, #tpu.memory_space<vmem>>, vector<72x512xf32>
    %11 = arith.mulf %9, %10 : vector<72x512xf32>
    %c0_3 = arith.constant 0 : index
    %c0_4 = arith.constant 0 : index
    %12 = vector.load %arg3[%c0_3, %c0_4] : memref<16x72xf32, #tpu.memory_space<vmem>>, vector<16x72xf32>
    %cst = arith.constant dense<0.000000e+00> : vector<16x512xf32>
    %13 = tpu.matmul %12, %11, %cst {dimension_numbers = #tpu.dot_dimension_numbers<[1], [0], [0], [1], [0, 0, 1, 1], [], []>} : vector<16x72xf32>, vector<72x512xf32>, vector<16x512xf32> -> vector<16x512xf32>
    %cst_5 = arith.constant 0.000000e+00 : f32
    %14 = vector.broadcast %cst_5 : f32 to vector<16x512xf32>
    %15 = arith.cmpf ogt, %13, %14 : vector<16x512xf32>
    %cst_6 = arith.constant 1.000000e-01 : f32
    %16 = vector.broadcast %cst_6 : f32 to vector<16x512xf32>
    %17 = arith.mulf %16, %13 : vector<16x512xf32>
    %18 = arith.select %15, %13, %17 : vector<16x512xi1>, vector<16x512xf32>
    %c0_7 = arith.constant 0 : index
    %c0_8 = arith.constant 0 : index
    %19 = vector.load %arg4[%c0_7, %c0_8] : memref<12x16xf32, #tpu.memory_space<vmem>>, vector<12x16xf32>
    %cst_9 = arith.constant dense<0.000000e+00> : vector<12x512xf32>
    %20 = tpu.matmul %19, %18, %cst_9 {dimension_numbers = #tpu.dot_dimension_numbers<[1], [0], [0], [1], [0, 0, 1, 1], [], []>} : vector<12x16xf32>, vector<16x512xf32>, vector<12x512xf32> -> vector<12x512xf32>
    %c0_10 = arith.constant 0 : index
    %c0_11 = arith.constant 0 : index
    %21 = vector.load %arg5[%c0_10, %c0_11] : memref<12x512xf32, #tpu.memory_space<vmem>>, vector<12x512xf32>
    tpu.vector_store %arg5[%c0_10, %c0_11], %20 {strides = array<i32>} : memref<12x512xf32, #tpu.memory_space<vmem>>, vector<12x512xf32>,
    return
  }
  func.func @transform_0(%arg0: i32) -> (i32, i32) {
    %c0_i32 = arith.constant 0 : i32
    %c0_i32_0 = arith.constant 0 : i32
    return %c0_i32, %arg0 : i32, i32
  }
  func.func @transform_1(%arg0: i32) -> (i32, i32) {
    %c0_i32 = arith.constant 0 : i32
    %c0_i32_0 = arith.constant 0 : i32
    %c0_i32_1 = arith.constant 0 : i32
    return %c0_i32, %c0_i32_0 : i32, i32
  }
  func.func @transform_2(%arg0: i32) -> (i32, i32) {
    %c0_i32 = arith.constant 0 : i32
    %c0_i32_0 = arith.constant 0 : i32
    %c0_i32_1 = arith.constant 0 : i32
    return %c0_i32, %c0_i32_0 : i32, i32
  }
  func.func @transform_3(%arg0: i32) -> (i32, i32) {
    %c0_i32 = arith.constant 0 : i32
    %c0_i32_0 = arith.constant 0 : i32
    %c0_i32_1 = arith.constant 0 : i32
    return %c0_i32, %c0_i32_0 : i32, i32
  }
  func.func @transform_4(%arg0: i32) -> (i32, i32) {
    %c0_i32 = arith.constant 0 : i32
    %c0_i32_0 = arith.constant 0 : i32
    return %c0_i32, %arg0 : i32, i32
  }
}

</mosaic_0001>

<bundles_post_ra>
// kernel: _final_conv_impl.1
= control target key start
LH: loop header
LB: loop body
LE: loop exit
PB: predicated region body
PF: predicated region fallthrough
CT: control target
= control target key end

     0   :  { %s618_s19 = smov 17   ;;  %s619_s24 = smov 16   ;;  %v625_v4 = vmov 0.0   ;;  %v29_v5 = vlaneseq  ;;  %vm201_vm8 = vcmask 588800   ;;  %s928_s0 = inlined_call_operand.vmem [shape: f32[8,512], index: 0, kind: input, shape index: {}]   ;;  %s929_s1 = inlined_call_operand.vmem [shape: f32[72,512], index: 1, kind: input, shape index: {}]   ;;  %s930_s2 = inlined_call_operand.vmem [shape: f32[16,72], index: 2, kind: input, shape index: {}]   ;;  %s931_s3 = inlined_call_operand.vmem [shape: f32[12,16], index: 3, kind: input, shape index: {}]   ;;  %s932_s4 = inlined_call_operand.vmem [shape: f32[12,512], index: 4, kind: output, shape index: {}]  }
   0x1   :  { %v655_v0 = vld [vmem:[%s928_s0 + $0x10] sm:$0xff]  ;;  %v660_v1 = vld [vmem:[%s928_s0] sm:$0xff]  ;;  %v667_v2 = vld [vmem:[%s928_s0 + $0x18] sm:$0xff]  ;;  %s620_s25 = smov 15   ;;  %s622_s26 = smov 127   ;;  %272 = vmatprep.mubr.f32.mxu0 %v625_v4  ;;  %349 = vmatprep.mubr.f32.mxu1 %v625_v4 }
   0x2   :  { %25 = vrot.lane.b32.xlu1 %v655_v0, %s618_s19  ;;  %21 = vrot.lane.b32.xlu0 %v660_v1, %s618_s19  ;;  %v672_v3 = vld [vmem:[%s928_s0 + $0x8] sm:$0xff]  ;;  %s621_s0 = smov 1   ;;  %s623_s27 = smov 113   ;;  %v706_v8 = vand.u32 127, %v29_v5  ;;  %v127_v16 = vld [vmem:[%s929_s1] sm:$0xff] }
   0x3   :  { %s624_s28 = smov 112   ;;  %s626_s29 = smov 111   ;;  %v128_v12 = vld [vmem:[%s929_s1 + $0x8] sm:$0xff]  ;;  %v129_v19 = vld [vmem:[%s929_s1 + $0x10] sm:$0xff]  ;;  %v131_v21 = vld [vmem:[%s929_s1 + $0x20] sm:$0xff] }
   0x4   :  { %vm31_vm0 = vcmp.lt.s32.totalorder %v706_v8, 17  ;;  %vm44_vm1 = vcmp.lt.s32.totalorder %v706_v8, 16  ;;  %v132_v13 = vld [vmem:[%s929_s1 + $0x28] sm:$0xff]  ;;  %v133_v25 = vld [vmem:[%s929_s1 + $0x30] sm:$0xff]  ;;  %v130_v26 = vld [vmem:[%s929_s1 + $0x18] sm:$0xff]  ;;  %vm57_vm2 = vcmp.lt.s32.totalorder %v706_v8, 15 }
   0x5   :  { %v134_v27 = vld [vmem:[%s929_s1 + $0x38] sm:$0xff]  ;;  %vm70_vm3 = vcmp.lt.s32.totalorder %v706_v8, 1  ;;  %v136_v47 = vld [vmem:[%s929_s1 + $0x48] sm:$0xff]  ;;  %v135_v52 = vld [vmem:[%s929_s1 + $0x40] sm:$0xff]  ;;  %vm83_vm4 = vcmp.lt.s32.totalorder %v706_v8, 127  ;;  %vm109_vm5 = vcmp.lt.s32.totalorder %v706_v8, 112 }
   0x6   :  { %27 = vrot.lane.b32.xlu1 %v667_v2, %s618_s19  ;;  %23 = vrot.lane.b32.xlu0 %v672_v3, %s618_s19  ;;  %v140_v49 = vld [vmem:[%s929_s1 + $0x68] sm:$0xff]  ;;  %v137_v56 = vld [vmem:[%s929_s1 + $0x50] sm:$0xff]  ;;  %vm96_vm6 = vcmp.lt.s32.totalorder %v706_v8, 113  ;;  %vm122_vm7 = vcmp.lt.s32.totalorder %v706_v8, 111 }
   0x7   :  { %v138_v57 = vld [vmem:[%s929_s1 + $0x58] sm:$0xff]  ;;  %v139_v61 = vld [vmem:[%s929_s1 + $0x60] sm:$0xff]  ;;  %v141_v62 = vld [vmem:[%s929_s1 + $0x70] sm:$0xff] }
   0x8   :  { %v142_v63 = vld [vmem:[%s929_s1 + $0x78] sm:$0xff]  ;;  %v200_v8 = vld [vmem:[%s930_s2 + $0x8] sm:$0xff] }
   0xa   :  { %38 = vrot.lane.b32.xlu1 %v672_v3, %s619_s24  ;;  %36 = vrot.lane.b32.xlu0 %v660_v1, %s619_s24 }
   0xe   :  { %42 = vrot.lane.b32.xlu1 %v667_v2, %s619_s24  ;;  %40 = vrot.lane.b32.xlu0 %v655_v0, %s619_s24 }
  0x12   :  { %51 = vrot.lane.b32.xlu1 %v672_v3, %s620_s25  ;;  %49 = vrot.lane.b32.xlu0 %v660_v1, %s620_s25 }
  0x16   :  { %55 = vrot.lane.b32.xlu1 %v667_v2, %s620_s25  ;;  %53 = vrot.lane.b32.xlu0 %v655_v0, %s620_s25 }
  0x1a   :  { %64 = vrot.lane.b32.xlu1 %v672_v3, %s621_s0  ;;  %62 = vrot.lane.b32.xlu0 %v660_v1, %s621_s0 }
  0x1e   :  { %68 = vrot.lane.b32.xlu1 %v667_v2, %s621_s0  ;;  %66 = vrot.lane.b32.xlu0 %v655_v0, %s621_s0 }
  0x22   :  { %77 = vrot.lane.b32.xlu1 %v672_v3, %s622_s26  ;;  %75 = vrot.lane.b32.xlu0 %v660_v1, %s622_s26 }
  0x26   :  { %81 = vrot.lane.b32.xlu1 %v667_v2, %s622_s26  ;;  %79 = vrot.lane.b32.xlu0 %v655_v0, %s622_s26 }
  0x2a   :  { %90 = vrot.lane.b32.xlu1 %v672_v3, %s623_s27  ;;  %88 = vrot.lane.b32.xlu0 %v660_v1, %s623_s27 }
  0x2e   :  { %94 = vrot.lane.b32.xlu1 %v667_v2, %s623_s27  ;;  %92 = vrot.lane.b32.xlu0 %v655_v0, %s623_s27 }
  0x32   :  { %103 = vrot.lane.b32.xlu1 %v672_v3, %s624_s28  ;;  %101 = vrot.lane.b32.xlu0 %v660_v1, %s624_s28 }
  0x36   :  { %107 = vrot.lane.b32.xlu1 %v667_v2, %s624_s28  ;;  %105 = vrot.lane.b32.xlu0 %v655_v0, %s624_s28 }
  0x3a   :  { %116 = vrot.lane.b32.xlu1 %v672_v3, %s626_s29  ;;  %114 = vrot.lane.b32.xlu0 %v660_v1, %s626_s29 }
  0x3e   :  { %120 = vrot.lane.b32.xlu1 %v667_v2, %s626_s29  ;;  %118 = vrot.lane.b32.xlu0 %v655_v0, %s626_s29 }
  0x74   :  { %v26_v6 = vpop.permute.xlu1 %25  ;;  %v22_v7 = vpop.permute.xlu0 %21 }
  0x78   :  { %v28_v9 = vpop.permute.xlu1 %27  ;;  %v24_v10 = vpop.permute.xlu0 %23 }
  0x79   :  { %v34_v11 = vsel %vm31_vm0, %v22_v7, %v24_v10  ;;  %v35_v17 = vsel %vm31_vm0, %v28_v9, %v22_v7  ;;  %v33_v20 = vsel %vm31_vm0, %v24_v10, %v26_v6  ;;  %v32_v24 = vsel %vm31_vm0, %v26_v6, %v28_v9 }
  0x7a   :  { %v164_v22 = vmul.f32 %v128_v12, %v34_v11  ;;  %v163_v28 = vmul.f32 %v127_v16, %v35_v17  ;;  %v165_v32 = vmul.f32 %v129_v19, %v33_v20  ;;  %v166_v38 = vmul.f32 %v130_v26, %v32_v24  ;;  %v144_v24 = vld [vmem:[%s929_s1 + $0x88] sm:$0xff]  ;;  %v145_v26 = vld [vmem:[%s929_s1 + $0x90] sm:$0xff] }
  0x7c   :  { %v39_v14 = vpop.permute.xlu1 %38  ;;  %v37_v15 = vpop.permute.xlu0 %36 }
  0x7d   :  { %v47_v18 = vsel %vm44_vm1, %v37_v15, %v39_v14 }
  0x7e   :  { %v168_v23 = vmul.f32 %v132_v13, %v47_v18 }
  0x80   :  { %v43_v29 = vpop.permute.xlu1 %42  ;;  %v41_v30 = vpop.permute.xlu0 %40  ;;  %v569_v31 = vpack.c.bf16 %v168_v23, %v164_v22  ;;  %v143_v23 = vld [vmem:[%s929_s1 + $0x80] sm:$0xff] }
  0x81   :  { %v48_v33 = vsel %vm44_vm1, %v43_v29, %v37_v15  ;;  %v45_v34 = vsel %vm44_vm1, %v41_v30, %v43_v29  ;;  %v46_v35 = vsel %vm44_vm1, %v39_v14, %v41_v30  ;;  %v150_v29 = vld [vmem:[%s929_s1 + $0xb8] sm:$0xff]  ;;  %v148_v30 = vld [vmem:[%s929_s1 + $0xa8] sm:$0xff]  ;;  %vm388_vm1 = vcmask 130048  }
  0x82   :  { %v167_v36 = vmul.f32 %v131_v21, %v48_v33  ;;  %v169_v37 = vmul.f32 %v133_v25, %v46_v35  ;;  %570 = vmatprep.subr.bf16.mxu0 %v569_v31  ;;  %v170_v39 = vmul.f32 %v134_v27, %v45_v34  ;;  %v146_v25 = vld [vmem:[%s929_s1 + $0x98] sm:$0xff]  ;;  %v147_v27 = vld [vmem:[%s929_s1 + $0xa0] sm:$0xff]  ;;  %v149_v31 = vld [vmem:[%s929_s1 + $0xb0] sm:$0xff]  ;;  %v180_v34 = vmul.f32 %v144_v24, %v672_v3 }
  0x83   :  { %v182_v35 = vmul.f32 %v146_v25, %v667_v2  ;;  %v162_v25 = vld [vmem:[%s929_s1 + $0x118] sm:$0xff] }
  0x84   :  { %v52_v40 = vpop.permute.xlu1 %51  ;;  %v50_v41 = vpop.permute.xlu0 %49  ;;  %v571_v42 = vpack.c.bf16 %v167_v36, %v163_v28  ;;  %v585_v43 = vpack.c.bf16 %v170_v39, %v166_v38  ;;  %v587_v44 = vpack.c.bf16 %v169_v37, %v165_v32  ;;  %v179_v36 = vmul.f32 %v143_v23, %v660_v1 }
  0x85   :  { %v60_v48 = vsel %vm57_vm2, %v50_v41, %v52_v40  ;;  %v181_v37 = vmul.f32 %v145_v26, %v655_v0  ;;  %v160_v26 = vld [vmem:[%s929_s1 + $0x108] sm:$0xff] }
  0x86   :  { %572 = vmatpush1.bf16.msra.mxu0 %v571_v42  ;;  %586 = vmatprep.subr.bf16.mxu1 %v585_v43  ;;  %v172_v55 = vmul.f32 %v136_v47, %v60_v48 }
  0x87   :  { %588 = vmatpush1.bf16.msra.mxu1 %v587_v44 }
  0x88   :  { %v56_v45 = vpop.permute.xlu1 %55  ;;  %v54_v46 = vpop.permute.xlu0 %53 }
  0x89   :  { %v61_v53 = vsel %vm57_vm2, %v56_v45, %v50_v41  ;;  %v59_v58 = vsel %vm57_vm2, %v52_v40, %v54_v46  ;;  %v58_v60 = vsel %vm57_vm2, %v54_v46, %v56_v45 }
  0x8a   :  { %v171_v5 = vmul.f32 %v135_v52, %v61_v53  ;;  %v173_v10 = vmul.f32 %v137_v56, %v59_v58  ;;  %v174_v14 = vmul.f32 %v138_v57, %v58_v60  ;;  %v152_v53 = vld [vmem:[%s929_s1 + $0xc8] sm:$0xff]  ;;  %v155_v56 = vld [vmem:[%s929_s1 + $0xe0] sm:$0xff] }
  0x8b   :  { %v156_v60 = vld [vmem:[%s929_s1 + $0xe8] sm:$0xff] }
  0x8c   :  { %v65_v50 = vpop.permute.xlu1 %64  ;;  %v63_v51 = vpop.permute.xlu0 %62 }
  0x8d   :  { %v73_v54 = vsel %vm70_vm3, %v63_v51, %v65_v50 }
  0x8e   :  { %v176_v59 = vmul.f32 %v140_v49, %v73_v54 }
  0x90   :  { %v69_v6 = vpop.permute.xlu1 %68  ;;  %v67_v7 = vpop.permute.xlu0 %66  ;;  %v573_v9 = vpack.c.bf16 %v176_v59, %v172_v55  ;;  %v153_v55 = vld [vmem:[%s929_s1 + $0xd0] sm:$0xff]  ;;  %v158_v59 = vld [vmem:[%s929_s1 + $0xf8] sm:$0xff] }
  0x91   :  { %v74_v11 = vsel %vm70_vm3, %v69_v6, %v63_v51  ;;  %v71_v12 = vsel %vm70_vm3, %v67_v7, %v69_v6  ;;  %v72_v13 = vsel %vm70_vm3, %v65_v50, %v67_v7  ;;  %v154_v51 = vld [vmem:[%s929_s1 + $0xd8] sm:$0xff] }
  0x92   :  { %v175_v15 = vmul.f32 %v139_v61, %v74_v11  ;;  %v177_v16 = vmul.f32 %v141_v62, %v72_v13  ;;  %v178_v17 = vmul.f32 %v142_v63, %v71_v12  ;;  %574 = vmatprep.subr.bf16.mxu0 %v573_v9  ;;  %v157_v61 = vld [vmem:[%s929_s1 + $0xf0] sm:$0xff]  ;;  %v151_v62 = vld [vmem:[%s929_s1 + $0xc0] sm:$0xff] }
  0x94   :  { %v78_v18 = vpop.permute.xlu1 %77  ;;  %v76_v19 = vpop.permute.xlu0 %75  ;;  %v575_v20 = vpack.c.bf16 %v175_v15, %v171_v5  ;;  %v589_v21 = vpack.c.bf16 %v178_v17, %v174_v14  ;;  %v591_v22 = vpack.c.bf16 %v177_v16, %v173_v10 }
  0x95   :  { %v86_v28 = vsel %vm83_vm4, %v76_v19, %v78_v18 }
  0x96   :  { %576 = vmatpush1.bf16.msra.mxu0 %v575_v20  ;;  %590 = vmatprep.subr.bf16.mxu1 %v589_v21  ;;  %v183_v38 = vmul.f32 %v147_v27, %v86_v28  ;;  %v161_v27 = vld [vmem:[%s929_s1 + $0x110] sm:$0xff]  ;;  %v159_v28 = vld [vmem:[%s929_s1 + $0x100] sm:$0xff] }
  0x97   :  { %592 = vmatpush1.bf16.msra.mxu1 %v591_v22 }
  0x98   :  { %v82_v32 = vpop.permute.xlu1 %81  ;;  %v80_v33 = vpop.permute.xlu0 %79  ;;  %v579_v47 = vpack.c.bf16 %v183_v38, %v179_v36 }
  0x99   :  { %v87_v39 = vsel %vm83_vm4, %v82_v32, %v76_v19  ;;  %v84_v40 = vsel %vm83_vm4, %v80_v33, %v82_v32  ;;  %v85_v41 = vsel %vm83_vm4, %v78_v18, %v80_v33 }
  0x9a   :  { %v186_v42 = vmul.f32 %v150_v29, %v87_v39  ;;  %v184_v43 = vmul.f32 %v148_v30, %v85_v41  ;;  %v185_v44 = vmul.f32 %v149_v31, %v84_v40  ;;  %v199_v39 = vld [vmem:[%s930_s2] sm:$0xff] }
  0x9c   :  { %v91_v3 = vpop.permute.xlu1 %90  ;;  %v89_v45 = vpop.permute.xlu0 %88  ;;  %v577_v2 = vpack.c.bf16 %v184_v43, %v180_v34  ;;  %v593_v46 = vpack.c.bf16 %v186_v42, %v182_v35  ;;  %v595_v1 = vpack.c.bf16 %v185_v44, %v181_v37 }
  0x9d   :  { %v99_v63 = vsel %vm96_vm6, %v89_v45, %v91_v3 }
  0x9e   :  { %578 = vmatprep.subr.bf16.mxu0 %v577_v2  ;;  %594 = vmatprep.subr.bf16.mxu1 %v593_v46  ;;  %v187_v18 = vmul.f32 %v151_v62, %v99_v63 }
  0x9f   :  { %580 = vmatpush1.bf16.msra.mxu0 %v579_v47  ;;  %596 = vmatpush1.bf16.msra.mxu1 %v595_v1 }
  0xa0   :  { %v95_v0 = vpop.permute.xlu1 %94  ;;  %v93_v48 = vpop.permute.xlu0 %92 }
  0xa1   :  { %v100_v52 = vsel %vm96_vm6, %v95_v0, %v89_v45  ;;  %v98_v54 = vsel %vm96_vm6, %v91_v3, %v93_v48  ;;  %v97_v58 = vsel %vm96_vm6, %v93_v48, %v95_v0 }
  0xa2   :  { %v190_v5 = vmul.f32 %v154_v51, %v100_v52  ;;  %v188_v6 = vmul.f32 %v152_v53, %v98_v54  ;;  %v189_v14 = vmul.f32 %v153_v55, %v97_v58 }
  0xa4   :  { %v104_v49 = vpop.permute.xlu1 %103  ;;  %v102_v50 = vpop.permute.xlu0 %101 }
  0xa5   :  { %v112_v57 = vsel %vm109_vm5, %v102_v50, %v104_v49 }
  0xa6   :  { %v191_v10 = vmul.f32 %v155_v56, %v112_v57 }
  0xa8   :  { %v108_v7 = vpop.permute.xlu1 %107  ;;  %v106_v9 = vpop.permute.xlu0 %105  ;;  %v583_v24 = vpack.c.bf16 %v191_v10, %v187_v18 }
  0xa9   :  { %v113_v11 = vsel %vm109_vm5, %v108_v7, %v102_v50  ;;  %v110_v12 = vsel %vm109_vm5, %v106_v9, %v108_v7  ;;  %v111_v13 = vsel %vm109_vm5, %v104_v49, %v106_v9 }
  0xaa   :  { %v194_v15 = vmul.f32 %v158_v59, %v113_v11  ;;  %v192_v16 = vmul.f32 %v156_v60, %v111_v13  ;;  %v193_v17 = vmul.f32 %v157_v61, %v110_v12 }
  0xac   :  { %v117_v19 = vpop.permute.xlu1 %116  ;;  %v115_v20 = vpop.permute.xlu0 %114  ;;  %v581_v21 = vpack.c.bf16 %v192_v16, %v188_v6  ;;  %v597_v22 = vpack.c.bf16 %v194_v15, %v190_v5  ;;  %v599_v23 = vpack.c.bf16 %v193_v17, %v189_v14  ;;  %v386_v5 = vld [vmem:[%s931_s3] sm:$0xff]  ;;  %v387_v6 = vld [vmem:[%s931_s3 + $0x8] sm:$0xf] }
  0xad   :  { %v125_v29 = vsel %vm122_vm7, %v115_v20, %v117_v19 }
  0xae   :  { %582 = vmatprep.subr.bf16.mxu0 %v581_v21  ;;  %598 = vmatprep.subr.bf16.mxu1 %v597_v22  ;;  %v195_v38 = vmul.f32 %v159_v28, %v125_v29 }
  0xaf   :  { %584 = vmatpush1.bf16.msra.mxu0 %v583_v24  ;;  %600 = vmatpush1.bf16.msra.mxu1 %v599_v23 }
  0xb0   :  { %v121_v30 = vpop.permute.xlu1 %120  ;;  %v119_v31 = vpop.permute.xlu0 %118 }
  0xb1   :  { %v126_v32 = vsel %vm122_vm7, %v121_v30, %v115_v20  ;;  %v123_v33 = vsel %vm122_vm7, %v119_v31, %v121_v30  ;;  %v124_v34 = vsel %vm122_vm7, %v117_v19, %v119_v31 }
  0xb2   :  { %v198_v35 = vmul.f32 %v162_v25, %v126_v32  ;;  %v196_v36 = vmul.f32 %v160_v26, %v124_v34  ;;  %v197_v37 = vmul.f32 %v161_v27, %v123_v33 }
  0xb4   :  { %224 = vmatprep.subr.mxu0 %v196_v36  ;;  %301 = vmatprep.subr.mxu1 %v198_v35 }
  0xb5   :  { %225 = vmatpush1.msra.mxu0 %v195_v38  ;;  %302 = vmatpush1.msra.mxu1 %v197_v37 }
  0xb6   :  { %561 = vmatmul.mubr.msk.f32.vlgmr.msra.gmra.mrb[0].mxu0 %vm201_vm8, %v199_v39  ;;  %563 = vmatmul.mubr.msk.f32.vlgmr.msra.gmra.mrb[0].mxu1 %vm201_vm8, %v199_v39 }
  0xb7   :  { %278 = vmatprep.mubr.f32.mxu0 %v625_v4  ;;  %355 = vmatprep.mubr.f32.mxu1 %v625_v4 }
  0xba   :  { %562 = vmatmul.mubr.msk.f32.gmra.mrb[2].mxu0 %vm201_vm8, %v200_v8  ;;  %564 = vmatmul.mubr.msk.f32.gmra.mrb[2].mxu1 %vm201_vm8, %v200_v8 }
  0xbb   :  { %459 = vmatprep.mubr.f32.mxu0 %v625_v4  ;;  %536 = vmatprep.mubr.f32.mxu1 %v625_v4 }
 0x189   :  { %v274_v40 = vpop.f32.mrb[0].mxu0  ;;  %v351_v41 = vpop.f32.mrb[0].mxu1 }
 0x18a   :  { %v370_v42 = vmul.f32 0.1, %v274_v40  ;;  %vm362_vm9 = vcmp.gt.f32.partialorder %v274_v40, 0.0  ;;  %v276_v43 = vpop.f32.mrb[1].mxu0  ;;  %v353_v44 = vpop.f32.mrb[1].mxu1  ;;  %vm364_vm10 = vcmp.gt.f32.partialorder %v351_v41, 0.0 }
 0x18b   :  { %v372_v3 = vmul.f32 0.1, %v351_v41  ;;  %vm363_vm11 = vcmp.gt.f32.partialorder %v276_v43, 0.0  ;;  %v371_v45 = vmul.f32 0.1, %v276_v43  ;;  %vm365_vm14 = vcmp.gt.f32.partialorder %v353_v44, 0.0 }
 0x18c   :  { %v373_v2 = vmul.f32 0.1, %v353_v44  ;;  %v378_v47 = vsel %vm362_vm9, %v274_v40, %v370_v42 }
 0x18d   :  { %v280_v46 = vpop.f32.mrb[2].mxu0  ;;  %v357_v1 = vpop.f32.mrb[2].mxu1  ;;  %v380_v52 = vsel %vm364_vm10, %v351_v41, %v372_v3  ;;  %v379_v55 = vsel %vm363_vm11, %v276_v43, %v371_v45 }
 0x18e   :  { %vm366_vm12 = vcmp.gt.f32.partialorder %v280_v46, 0.0  ;;  %v374_v0 = vmul.f32 0.1, %v280_v46  ;;  %vm368_vm13 = vcmp.gt.f32.partialorder %v357_v1, 0.0  ;;  %v282_v48 = vpop.f32.mrb[3].mxu0  ;;  %v359_v49 = vpop.f32.mrb[3].mxu1  ;;  %v381_v59 = vsel %vm365_vm14, %v353_v44, %v373_v2 }
 0x18f   :  { %v376_v50 = vmul.f32 0.1, %v357_v1  ;;  %vm367_vm15 = vcmp.gt.f32.partialorder %v282_v48, 0.0  ;;  %v375_v51 = vmul.f32 0.1, %v282_v48  ;;  %vm369_vm0 = vcmp.gt.f32.partialorder %v359_v49, 0.0 }
 0x190   :  { %v382_v53 = vsel %vm366_vm12, %v280_v46, %v374_v0  ;;  %v377_v54 = vmul.f32 0.1, %v359_v49 }
 0x191   :  { %v603_v56 = vpack.c.bf16 %v382_v53, %v378_v47  ;;  %v384_v57 = vsel %vm368_vm13, %v357_v1, %v376_v50  ;;  %v383_v58 = vsel %vm367_vm15, %v282_v48, %v375_v51 }
 0x192   :  { %v607_v60 = vpack.c.bf16 %v384_v57, %v380_v52  ;;  %v385_v61 = vsel %vm369_vm0, %v359_v49, %v377_v54  ;;  %v601_v62 = vpack.c.bf16 %v383_v58, %v379_v55 }
 0x193   :  { %v605_v63 = vpack.c.bf16 %v385_v61, %v381_v59 }
 0x194   :  { %602 = vmatprep.subr.bf16.mxu0 %v601_v62 }
 0x195   :  { %606 = vmatprep.subr.bf16.mxu1 %v605_v63  ;;  %604 = vmatpush1.bf16.msra.mxu0 %v603_v56 }
 0x196   :  { %608 = vmatpush1.bf16.msra.mxu1 %v607_v60 }
 0x198   :  { %565 = vmatmul.mubr.msk.f32.vlgmr.msra.gmra.mrb[4].mxu0 %vm388_vm1, %v386_v5 }
 0x199   :  { %567 = vmatmul.mubr.msk.f32.vlgmr.msra.gmra.mrb[4].mxu1 %vm388_vm1, %v386_v5  ;;  %465 = vmatprep.mubr.f32.mxu0 %v625_v4 }
 0x19a   :  { %542 = vmatprep.mubr.f32.mxu1 %v625_v4 }
 0x19c   :  { %566 = vmatmul.mubr.msk.f32.gmra.mrb[6].mxu0 %vm388_vm1, %v387_v6 }
 0x19d   :  { %568 = vmatmul.mubr.msk.f32.gmra.mrb[6].mxu1 %vm388_vm1, %v387_v6 }
 0x26b   :  { %v461_v7 = vpop.f32.mrb[4].mxu0 }
 0x26c   :  { %549 = vst [vmem:[%s932_s4] sm:$0xff] %v461_v7  ;;  %v538_v9 = vpop.f32.mrb[4].mxu1  ;;  %v463_v10 = vpop.f32.mrb[5].mxu0 }
 0x26d   :  { %551 = vst [vmem:[%s932_s4 + $0x10] sm:$0xff] %v538_v9  ;;  %550 = vst [vmem:[%s932_s4 + $0x8] sm:$0xff] %v463_v10  ;;  %v540_v11 = vpop.f32.mrb[5].mxu1 }
 0x26e   :  { %552 = vst [vmem:[%s932_s4 + $0x18] sm:$0xff] %v540_v11 }
 0x26f   :  { %v467_v4 = vpop.f32.mrb[6].mxu0 }
 0x270   :  { %553 = vst [vmem:[%s932_s4 + $0x20] sm:$0xf] %v467_v4  ;;  %v544_v12 = vpop.f32.mrb[6].mxu1  ;;  %v469_v13 = vpop.f32.mrb[7].mxu0 }
 0x271   :  { %555 = vst [vmem:[%s932_s4 + $0x30] sm:$0xf] %v544_v12  ;;  %554 = vst [vmem:[%s932_s4 + $0x28] sm:$0xf] %v469_v13  ;;  %v546_v14 = vpop.f32.mrb[7].mxu1 }
 0x272   :  { %556 = vst [vmem:[%s932_s4 + $0x38] sm:$0xf] %v546_v14 }

</bundles_post_ra>
